<compile_context>
chip_gen: v5e
topology: v5e:2x2
jax: 0.10.0
libtpu: 0.0.40
codegen_flags: <defaults>
</compile_context>

<pallas_src>
import functools

import jax
import jax.numpy as jnp
from jax.experimental import pallas as pl
from jax.experimental.pallas import tpu as pltpu


def _round_up(x, m):
    return ((x + m - 1) // m) * m


def linear_tanh_kernel(z_ref, w_ref, b_ref, o_ref):
    # z_ref: (TB, H)          activation tile
    # w_ref: (H, OUT)         pre-transposed weight (VMEM-resident across steps)
    # b_ref: (1, OUT)         bias (VMEM-resident across steps)
    # o_ref: (TB, OUT)        output tile (lane-dense along OUT)
    acc = jnp.dot(z_ref[...], w_ref[...], preferred_element_type=jnp.float32)
    o_ref[...] = jnp.tanh(acc + b_ref[...]).astype(o_ref.dtype)


@functools.partial(jax.jit, static_argnames=("hidden_channels", "input_channels"))
def f_forward(t, z, weight, bias, hidden_channels, input_channels):
    """Equivalent of F.forward(t, z).

    z:      (*batch_dims, hidden_channels)  float32
    weight: (hidden_channels * input_channels, hidden_channels)  (PyTorch layout)
    bias:   (hidden_channels * input_channels,)
    returns (*batch_dims, hidden_channels, input_channels)
    """
    del t  # unused by the PyTorch module's forward
    batch_dims = z.shape[:-1]
    hidden = z.shape[-1]
    out_features = hidden_channels * input_channels

    # Flatten batch dims; one-time (16 KiB) wrapper-side weight transpose so the
    # kernel's matmul needs no in-body XLU transpose.
    z2d = z.reshape((-1, hidden))
    w_t = weight.T                                  # (hidden, out_features)
    b2d = bias.reshape((1, out_features))
    B = z2d.shape[0]

    # Batch tile: as large as 4096 rows (HBM-bound kernel => amortize per-step
    # overhead), but split into >=2 grid steps when possible so megacore
    # sharding on v7x has work for both TensorCores. Always a multiple of 8
    # (sublane); Pallas masks the ragged last block, no padding/slicing needed.
    TB_MAX = 4096
    TB = min(TB_MAX, _round_up(max((B + 1) // 2, 1), 8))
    grid = (pl.cdiv(B, TB),)

    itemsize = jnp.dtype(z.dtype).itemsize
    cost = pl.CostEstimate(
        flops=2 * B * hidden * out_features,
        transcendentals=B * out_features,
        bytes_accessed=(B * hidden + hidden * out_features + out_features
                        + B * out_features) * itemsize,
    )

    out2d = pl.pallas_call(
        linear_tanh_kernel,
        out_shape=jax.ShapeDtypeStruct((B, out_features), z.dtype),
        grid=grid,
        in_specs=[
            pl.BlockSpec((TB, hidden), lambda i: (i, 0)),
            pl.BlockSpec((hidden, out_features), lambda i: (0, 0)),  # resident
            pl.BlockSpec((1, out_features), lambda i: (0, 0)),       # resident
        ],
        out_specs=pl.BlockSpec((TB, out_features), lambda i: (i, 0)),
        compiler_params=pltpu.CompilerParams(
            dimension_semantics=("parallel",),   # megacore sharding on v7x
        ),
        cost_estimate=cost,
    )(z2d, w_t, b2d)

    # view(*batch_dims, hidden_channels, input_channels)
    return out2d.reshape(*batch_dims, hidden_channels, input_channels)


if __name__ == "__main__":
    # Small shapes consistent with the module.
    input_channels = 4
    hidden_channels = 32

    key = jax.random.PRNGKey(0)
    k_w, k_b, k_z1, k_z2, k_t = jax.random.split(key, 5)

    # Deterministic parameter init (mimic PyTorch Linear's U(-1/sqrt(in), 1/sqrt(in))).
    bound = 1.0 / jnp.sqrt(jnp.float32(hidden_channels))
    weight = jax.random.uniform(
        k_w, (hidden_channels * input_channels, hidden_channels),
        minval=-bound, maxval=bound, dtype=jnp.float32)
    bias = jax.random.uniform(
        k_b, (hidden_channels * input_channels,),
        minval=-bound, maxval=bound, dtype=jnp.float32)

    t = jax.random.normal(k_t, (), dtype=jnp.float32)  # unused, as in the module

    def reference(z):
        batch_dims = z.shape[:-1]
        return jnp.tanh(z @ weight.T + bias).reshape(
            *batch_dims, hidden_channels, input_channels)

    # Case 1: simple 2-D batch (batch=2), exercises the ragged (partial-block) path.
    z1 = jax.random.normal(k_z1, (2, hidden_channels), dtype=jnp.float32)
    out1 = jax.block_until_ready(
        f_forward(t, z1, weight, bias, hidden_channels, input_channels))
    assert out1.shape == (2, hidden_channels, input_channels)
    assert jnp.allclose(out1, reference(z1), atol=1e-5, rtol=1e-5)

    # Case 2: multiple batch dims (2, 8) -> flattened B=16, exercises the
    # two-grid-step path (TB=8, grid=(2,)).
    z2 = jax.random.normal(k_z2, (2, 8, hidden_channels), dtype=jnp.float32)
    out2 = jax.block_until_ready(
        f_forward(t, z2, weight, bias, hidden_channels, input_channels))
    assert out2.shape == (2, 8, hidden_channels, input_channels)
    assert jnp.allclose(out2, reference(z2), atol=1e-5, rtol=1e-5)

    print("KERNEL_OK")
</pallas_src>

<mosaic_0001>
module attributes {stable_mosaic.version = 11 : i64} {
  func.func @linear_tanh_kernel(%arg0: i32, %arg1: memref<8x32xf32, #tpu.memory_space<vmem>>, %arg2: memref<32x128xf32, #tpu.memory_space<vmem>>, %arg3: memref<1x128xf32, #tpu.memory_space<vmem>>, %arg4: memref<8x128xf32, #tpu.memory_space<vmem>>) attributes {dimension_semantics = [#tpu.dimension_semantics<parallel>], iteration_bounds = array<i64: 1>, scalar_prefetch = 0 : i64, scratch_operands = 0 : i64, tpu.core_type = #tpu.core_type<tc>, window_params = [{transform_indices = @transform_0, window_bounds = array<i64: 8, 32>}, {pipeline_mode = #tpu.pipeline_mode<synchronous>, transform_indices = @transform_1, window_bounds = array<i64: 32, 128>}, {pipeline_mode = #tpu.pipeline_mode<synchronous>, transform_indices = @transform_2, window_bounds = array<i64: 1, 128>}, {transform_indices = @transform_3, window_bounds = array<i64: 8, 128>}]} {
    %c0 = arith.constant 0 : index
    %c0_0 = arith.constant 0 : index
    %0 = vector.load %arg1[%c0, %c0_0] : memref<8x32xf32, #tpu.memory_space<vmem>>, vector<8x32xf32>
    %c0_1 = arith.constant 0 : index
    %c0_2 = arith.constant 0 : index
    %1 = vector.load %arg2[%c0_1, %c0_2] : memref<32x128xf32, #tpu.memory_space<vmem>>, vector<32x128xf32>
    %cst = arith.constant dense<0.000000e+00> : vector<8x128xf32>
    %2 = tpu.matmul %0, %1, %cst {dimension_numbers = #tpu.dot_dimension_numbers<[1], [0], [0], [1], [0, 0, 1, 1], [], []>} : vector<8x32xf32>, vector<32x128xf32>, vector<8x128xf32> -> vector<8x128xf32>
    %c0_3 = arith.constant 0 : index
    %c0_4 = arith.constant 0 : index
    %3 = vector.load %arg3[%c0_3, %c0_4] : memref<1x128xf32, #tpu.memory_space<vmem>>, vector<1x128xf32>
    %4 = vector.broadcast %3 : vector<1x128xf32> to vector<8x128xf32>
    %5 = arith.addf %2, %4 : vector<8x128xf32>
    %6 = math.tanh %5 : vector<8x128xf32>
    %c0_5 = arith.constant 0 : index
    %c0_6 = arith.constant 0 : index
    %7 = vector.load %arg4[%c0_5, %c0_6] : memref<8x128xf32, #tpu.memory_space<vmem>>, vector<8x128xf32>
    tpu.vector_store %arg4[%c0_5, %c0_6], %6 {strides = array<i32>} : memref<8x128xf32, #tpu.memory_space<vmem>>, vector<8x128xf32>,
    return
  }
  func.func @transform_0(%arg0: i32) -> (i32, i32) {
    %c0_i32 = arith.constant 0 : i32
    %c0_i32_0 = arith.constant 0 : i32
    return %arg0, %c0_i32 : i32, i32
  }
  func.func @transform_1(%arg0: i32) -> (i32, i32) {
    %c0_i32 = arith.constant 0 : i32
    %c0_i32_0 = arith.constant 0 : i32
    %c0_i32_1 = arith.constant 0 : i32
    return %c0_i32, %c0_i32_0 : i32, i32
  }
  func.func @transform_2(%arg0: i32) -> (i32, i32) {
    %c0_i32 = arith.constant 0 : i32
    %c0_i32_0 = arith.constant 0 : i32
    %c0_i32_1 = arith.constant 0 : i32
    return %c0_i32, %c0_i32_0 : i32, i32
  }
  func.func @transform_3(%arg0: i32) -> (i32, i32) {
    %c0_i32 = arith.constant 0 : i32
    %c0_i32_0 = arith.constant 0 : i32
    return %arg0, %c0_i32 : i32, i32
  }
}

</mosaic_0001>

<bundles_post_ra>
// kernel: f_forward.1
= control target key start
LH: loop header
LB: loop body
LE: loop exit
PB: predicated region body
PF: predicated region fallthrough
CT: control target
= control target key end

     0   :  { %8 = vsyncpa [#allocation3], 0  ;;  %s224_s0 = inlined_call_operand.hbm [shape: f32[2,32], index: 0, kind: input, shape index: {}]   ;;  %s225_s1 = inlined_call_operand.hbm [shape: f32[32,128], index: 1, kind: input, shape index: {}]   ;;  %s226_s2 = inlined_call_operand.vmem [shape: f32[1,128], index: 2, kind: input, shape index: {}]   ;;  %s227_s3 = inlined_call_operand.vmem [shape: f32[2,128], index: 3, kind: output, shape index: {}]  }
   0x1   :  { %9 = vsyncpa [#allocation5], 0 }
   0x2   :  { %13 = vsyncadd [#allocation3], 96  ;;  %s14_s14 = sshll.u32 %s224_s0, 4  ;;  %s186_s15 = smov [#allocation2]   ;;  %s15_s14 = int_to_ptr.hbm [resolvable:$true] %s14_s14 }
   0x3   :  { %s16_s16 = sshll.u32 %s186_s15, 4  ;;  %s27_s19 = sshll.u32 %s225_s1, 4  ;;  %s17_s16 = int_to_ptr.vmem [resolvable:$true] %s16_s16  ;;  %s28_s19 = int_to_ptr.hbm [resolvable:$true] %s27_s19 }
   0x4   :  { %s187_s20 = smov 32   ;;  %s188_s21 = smov 2  }
   0x5   :  { %22 = dma.hbm_to_vmem [thread:$0]  %s15_s14, 32, %s17_s16, [#allocation3], %s187_s20, %s187_s20, %s188_s21  }
   0x6   :  { %s189_s22 = smov [#allocation4]   ;;  %s190_s24 = smov 128  }
   0x7   :  { %s29_s23 = sshll.u32 %s189_s22, 4  ;;  %s191_s25 = smov 8   ;;  %s30_s23 = int_to_ptr.vmem [resolvable:$true] %s29_s23 }
   0x8   :  { %35 = dma.hbm_to_vmem [thread:$0]  %s28_s19, 512, %s30_s23, [#allocation5], %s190_s24, %s190_s24, %s191_s25  }
   0x9   :  { %182 = dma.done.wait [#allocation3], 128  }
   0xa   :  { %183 = vsyncadd [#allocation3], 4294967168 }
   0xb   :  { %184 = dma.done.wait [#allocation5], 512  }
   0xc   :  { %185 = vsyncadd [#allocation5], 4294966784  ;;  %v50_v0 = vld [vmem:[#allocation4 + $0x18] sm:$0xff]  ;;  %v49_v1 = vld [vmem:[#allocation4 + $0x10] sm:$0xff]  ;;  %vm55_vm0 = vcmask 261120  }
   0xd   :  { %71 = vmatpush.msra.mxu0 %v50_v0  ;;  %v48_v2 = vld [vmem:[#allocation4 + $0x8] sm:$0xff]  ;;  %v47_v3 = vld [vmem:[#allocation4] sm:$0xff]  ;;  %v46_v4 = vld [vmem:[#allocation2] sm:$0xff] }
   0xe   :  { %v131_v5 = vld [vmem:[%s226_s2] ss:$0 sm:$0xff] }
   0xf   :  { %72 = vmatpush.msra.mxu0 %v49_v1 }
  0x11   :  { %73 = vmatpush.msra.mxu0 %v48_v2 }
  0x13   :  { %74 = vmatpush.msra.mxu0 %v47_v3 }
  0x14   :  { %124 = vmatmul.msk.f32.vlgmr.msra.gmra.mxu0 %vm55_vm0, %v46_v4 }
  0x91   :  { %v76_v6 = vpop.f32.mrf.mxu0 }
  0x92   :  { %v77_v7 = vadd.f32 %v131_v5, %v76_v6 }
  0x94   :  { %132 = vtanh.f32 %v77_v7 }
  0x9a   :  { %v133_v8 = vpop.eup %132 }
  0x9b   :  { %80 = vst [vmem:[#allocation6] sm:$0xff] %v133_v8 }
  0xa2   :  { %v99_v9 = vld [vmem:[#allocation6] sm:$0x3] }
  0xa3   :  { %100 = vst [vmem:[%s227_s3] sm:$0x3] %v99_v9 }
  0xa4   :  { %118 = vsyncpa [#allocation3], 1 }
  0xa5   :  { %119 = vsyncpa [#allocation5], 1 }

</bundles_post_ra>
